<compile_context>
chip_gen: v7x
topology: tpu7x:2x2x1
jax: 0.10.0
libtpu: 0.0.40
codegen_flags: <defaults>
</compile_context>

<pallas_src>
import math
import numpy as np
import jax
import jax.numpy as jnp
from jax.experimental import pallas as pl
from jax.experimental.pallas import tpu as pltpu

PI = math.pi


def _parse_name(name: str) -> float:
    return float(name.split("_")[1])


def build_gpe_frequencies(name: str, dim: int = 128) -> np.ndarray:
    """Deterministically reproduce bGPEInc.__init__: returns W = concat(ws), shape (dim//4,)."""
    assert dim % 4 == 0
    e = _parse_name(name)
    jz_len = [1]
    ws = [np.ones(1, dtype=np.float64) / 180.0 * PI]
    p = 1
    while True:
        p += 1
        le = int(np.ceil(-np.log(e) / np.log(p)))
        le = max(le, 1)
        le = min(le, dim // 4 - sum(jz_len))
        ws.append(np.array([p ** (i + 1) for i in range(le)], dtype=np.float64) / 180.0 * PI)
        jz_len.append(le)
        if sum(jz_len) >= dim // 4:
            break
    w = np.concatenate(ws).astype(np.float32)
    assert w.shape[0] == dim // 4
    return w


def _round_up(x: int, m: int) -> int:
    return ((x + m - 1) // m) * m


def _cdiv(a: int, b: int) -> int:
    return (a + b - 1) // b


def _gpe_kernel(t_ref, p_ref, o_ref):
    # t_ref: (tn, 3)  rows = [lat, lon, 1]
    # p_ref: (3, dim) rows = [Wlat_row, Wlon_row, phase_row] (VMEM-resident)
    # o_ref: (tn, dim)
    #
    # Whole affine argument (incl. the cos phase via sin(x + pi/2)) built on the
    # MXU so the VALU slots are spent only on the sin evaluation.
    arg = jnp.dot(
        t_ref[...],
        p_ref[...],
        preferred_element_type=jnp.float32,
        precision=jax.lax.Precision.HIGHEST,
    )
    # TODO(synk): if a bundle dump confirms the f32 sin lowering saturates the 4
    # VALU slots, switch to a folded-"turns" range reduction (1/(2*pi) folded
    # into the param table) + short odd minimax polynomial.
    o_ref[...] = jnp.sin(arg).astype(o_ref.dtype)


def _build_param_table(w: jax.Array, dim: int) -> jax.Array:
    """(3, dim) table matching input rows [lat, lon, 1]:
       row0 (lat):  [0 | 0 | W | W]
       row1 (lon):  [W | W | 0 | 0]
       row2 (one):  [0 | pi/2 | 0 | pi/2]      (cos(x) = sin(x + pi/2))
    """
    Q = dim // 4
    w = jnp.asarray(w, jnp.float32)
    z = jnp.zeros((Q,), jnp.float32)
    half_pi = jnp.full((Q,), np.float32(math.pi / 2.0))
    lat_row = jnp.concatenate([z, z, w, w])
    lon_row = jnp.concatenate([w, w, z, z])
    one_row = jnp.concatenate([z, half_pi, z, half_pi])
    return jnp.stack([lat_row, lon_row, one_row], axis=0)  # (3, dim)


def bgpe_inc_forward(
    T: jax.Array,
    w: jax.Array,
    dim: int,
    *,
    tile_n: int = 8192,
    out_dtype=jnp.float32,
) -> jax.Array:
    """T: (n,2) or (bs,n,2).  Returns (n,dim) or (bs,n,dim) in `out_dtype` (default f32).

    tile_n is a per-generation knob; 8192 amortizes the per-grid-step overhead
    while fitting the (correctly accounted) double-buffered VMEM working set on
    v5e/v6e/v7x once vmem_limit_bytes is raised (done below).
    """
    assert dim % 4 == 0
    Q = dim // 4
    w = jnp.asarray(w, jnp.float32)
    assert w.shape[0] == Q

    batched = T.ndim == 3
    T_flat = (T.reshape(-1, T.shape[-1]) if batched else T).astype(jnp.float32)
    N = T_flat.shape[0]

    # Rows become [lat, lon, 1] so the whole argument is one (tn,3)x(3,dim) dot.
    T3 = jnp.concatenate([T_flat, jnp.ones((N, 1), jnp.float32)], axis=-1)
    params = _build_param_table(w, dim)  # (3, dim)

    # ---- row-tile selection & VMEM budget -----------------------------------
    # Per-row VMEM cost (double-buffered input + output):
    #   input  (tn,3) f32 lane-pads to 128 lanes      -> 512 B / row / buffer
    #   output (tn,dim)  pads dim up to 128 lanes     -> round_up(dim,128)*itemsize
    in_row_bytes = 128 * 4
    out_row_bytes = _round_up(dim, 128) * jnp.dtype(out_dtype).itemsize
    bytes_per_row = 2 * (in_row_bytes + out_row_bytes)  # double-buffered in + out
    vmem_tile_budget = 32 << 20  # safe on v5e/v6e (128 MiB phys) and v7x (64 MiB/TC)

    cap = max(8, (int(tile_n) // 8) * 8)
    tn = max(
        8,
        min(
            cap,
            _round_up(_cdiv(N, 8), 8),                       # keep >=~8 grid steps (megacore)
            max(8, (vmem_tile_budget // bytes_per_row) // 8 * 8),
        ),
    )
    n_steps = _cdiv(N, tn)  # partial final block: reads padded, writes masked by Pallas
    vmem_limit = int(min(max(tn * bytes_per_row + (4 << 20), 16 << 20), 56 << 20))

    out = pl.pallas_call(
        _gpe_kernel,
        out_shape=jax.ShapeDtypeStruct((N, dim), out_dtype),
        grid=(n_steps,),
        in_specs=[
            pl.BlockSpec((tn, 3), lambda i: (i, 0)),
            pl.BlockSpec((3, dim), lambda i: (0, 0)),  # constant index -> stays VMEM-resident
        ],
        out_specs=pl.BlockSpec((tn, dim), lambda i: (i, 0)),
        compiler_params=pltpu.CompilerParams(
            dimension_semantics=("parallel",),
            vmem_limit_bytes=vmem_limit,
        ),
    )(T3, params)

    if batched:
        out = out.reshape(T.shape[0], -1, dim)
    return out


def bgpe_inc_reference_np(T: np.ndarray, w: np.ndarray, dim: int) -> np.ndarray:
    """float64 numpy reference of the original module math (sin/cos concat)."""
    Tn = np.asarray(T, dtype=np.float64)
    wn = np.asarray(w, dtype=np.float64)
    batched = Tn.ndim == 3
    Tf = Tn.reshape(-1, Tn.shape[-1])
    lat, lon = Tf[:, 0:1], Tf[:, 1:2]
    wlon, wlat = lon * wn[None, :], lat * wn[None, :]
    sc = np.concatenate([np.sin(wlon), np.cos(wlon), np.sin(wlat), np.cos(wlat)], axis=-1)
    if batched:
        sc = sc.reshape(Tn.shape[0], -1, dim)
    return sc


if __name__ == "__main__":
    dim = 128                      # dim % 4 == 0, Q = 32
    name = "gpe_0.001"             # e = 0.001 drives the per-base frequency counts
    w = jnp.asarray(build_gpe_frequencies(name, dim))   # (32,)

    key = jax.random.PRNGKey(0)
    bs, n = 2, 8
    # lat/lon-like coordinates in degrees
    T = jax.random.uniform(key, (bs, n, 2), dtype=jnp.float32, minval=-90.0, maxval=90.0)

    out = jax.block_until_ready(bgpe_inc_forward(T, w, dim))
    assert out.shape == (bs, n, dim) and out.dtype == jnp.float32
    ref = bgpe_inc_reference_np(np.asarray(T), np.asarray(w), dim)
    err = np.max(np.abs(np.asarray(out, np.float64) - ref))
    assert err < 3e-3, f"batched case max err {err}"

    # Non-divisible N: exercises the masked partial final block (no pad, no slice).
    T2 = jax.random.uniform(jax.random.PRNGKey(1), (37, 2), dtype=jnp.float32,
                            minval=-90.0, maxval=90.0)
    out2 = jax.block_until_ready(bgpe_inc_forward(T2, w, dim, tile_n=16))
    assert out2.shape == (37, dim)
    ref2 = bgpe_inc_reference_np(np.asarray(T2), np.asarray(w), dim)
    err2 = np.max(np.abs(np.asarray(out2, np.float64) - ref2))
    assert err2 < 3e-3, f"partial-block case max err {err2}"

    # Optional bf16 output path (halved HBM write traffic; compute stays f32).
    out_bf16 = jax.block_until_ready(bgpe_inc_forward(T, w, dim, out_dtype=jnp.bfloat16))
    assert out_bf16.shape == (bs, n, dim) and out_bf16.dtype == jnp.bfloat16
    err_bf16 = np.max(np.abs(np.asarray(out_bf16.astype(jnp.float32), np.float64) - ref))
    assert err_bf16 < 2e-2, f"bf16 case max err {err_bf16}"

    print("KERNEL_OK")
</pallas_src>

<mosaic_0001>
module attributes {stable_mosaic.version = 11 : i64} {
  func.func @_gpe_kernel(%arg0: i32, %arg1: memref<8x3xf32, #tpu.memory_space<vmem>>, %arg2: memref<3x128xf32, #tpu.memory_space<vmem>>, %arg3: memref<8x128xf32, #tpu.memory_space<vmem>>) attributes {dimension_semantics = [#tpu.dimension_semantics<parallel>], iteration_bounds = array<i64: 2>, scalar_prefetch = 0 : i64, scratch_operands = 0 : i64, tpu.core_type = #tpu.core_type<tc>, window_params = [{transform_indices = @transform_0, window_bounds = array<i64: 8, 3>}, {pipeline_mode = #tpu.pipeline_mode<synchronous>, transform_indices = @transform_1, window_bounds = array<i64: 3, 128>}, {transform_indices = @transform_2, window_bounds = array<i64: 8, 128>}]} {
    %c0 = arith.constant 0 : index
    %c0_0 = arith.constant 0 : index
    %0 = vector.load %arg1[%c0, %c0_0] : memref<8x3xf32, #tpu.memory_space<vmem>>, vector<8x3xf32>
    %c0_1 = arith.constant 0 : index
    %c0_2 = arith.constant 0 : index
    %1 = vector.load %arg2[%c0_1, %c0_2] : memref<3x128xf32, #tpu.memory_space<vmem>>, vector<3x128xf32>
    %cst = arith.constant dense<0.000000e+00> : vector<8x128xf32>
    %2 = tpu.matmul %0, %1, %cst {dimension_numbers = #tpu.dot_dimension_numbers<[1], [0], [0], [1], [0, 0, 1, 1], [], []>, precision = #tpu.contract_precision<fp32>} : vector<8x3xf32>, vector<3x128xf32>, vector<8x128xf32> -> vector<8x128xf32>
    %3 = math.sin %2 : vector<8x128xf32>
    %c0_3 = arith.constant 0 : index
    %c0_4 = arith.constant 0 : index
    %4 = vector.load %arg3[%c0_3, %c0_4] : memref<8x128xf32, #tpu.memory_space<vmem>>, vector<8x128xf32>
    tpu.vector_store %arg3[%c0_3, %c0_4], %3 {strides = array<i32>} : memref<8x128xf32, #tpu.memory_space<vmem>>, vector<8x128xf32>,
    return
  }
  func.func @transform_0(%arg0: i32) -> (i32, i32) {
    %c0_i32 = arith.constant 0 : i32
    %c0_i32_0 = arith.constant 0 : i32
    return %arg0, %c0_i32 : i32, i32
  }
  func.func @transform_1(%arg0: i32) -> (i32, i32) {
    %c0_i32 = arith.constant 0 : i32
    %c0_i32_0 = arith.constant 0 : i32
    %c0_i32_1 = arith.constant 0 : i32
    return %c0_i32, %c0_i32_0 : i32, i32
  }
  func.func @transform_2(%arg0: i32) -> (i32, i32) {
    %c0_i32 = arith.constant 0 : i32
    %c0_i32_0 = arith.constant 0 : i32
    return %arg0, %c0_i32 : i32, i32
  }
}

</mosaic_0001>

<bundles_post_ra>
// kernel: tpu_custom_call.1
= control target key start
LH: loop header
LB: loop body
LE: loop exit
PB: predicated region body
PF: predicated region fallthrough
CT: control target
= control target key end

     0   :  { %7 = vsyncpa [#allocation3], 0  ;;  %s1111_s0 = inlined_call_operand.vmem [shape: f32[16,3], index: 0, kind: input, shape index: {}]   ;;  %s1112_s1 = inlined_call_operand.vmem [shape: f32[3,128], index: 1, kind: input, shape index: {}]   ;;  %s1113_s2 = inlined_call_operand.hbm [shape: f32[16,128], index: 2, kind: output, shape index: {}]  }
   0x1   :  { %9 = vsyncpa [#allocation3 + $0x1], 0  ;;  %s981_s9 = smov 0   ;;  %s983_s10 = smov 0  }
   0x2   :  { %s985_s11 = smov 0   ;;  %s987_s12 = smov 0  }
   0x3 LB: > { %s1002_s13 = sadd.s32 4294967295, %s955_s12   ;;  %s773_s14 = sadd.s32 4294967294, %s955_s12   ;;  %s955_s12 = sphi %s987_s12, %s1119_s12   ;;  %s951_s11 = sphi %s985_s11, %s1118_s11   ;;  %s947_s10 = sphi %s983_s10, %s1117_s10   ;;  %s943_s9 = sphi %s981_s9, %s1116_s9  }
   0x4   : > { %s1006_s15 = sadd.s32 1, %s955_s12   ;;  %s69_s16 = sadd.s32 1, %s951_s11 }
   0x5   : > { %s66_s17 = ssub.s32 %s955_s12, %s1006_s15  ;;  %p79_p0 = scmp.ne.s32.totalorder %s951_s11, %s947_s10 }
   0x6   : > { %p67_p1 = scmp.eq.s32.totalorder %s66_s17, 0  ;;  %p80_p2 = scmp.eq.s32.totalorder %s1002_s13, 1 }
   0x7   : > { %p85_p3 = scmp.ne.s32.totalorder %s947_s10, %s943_s9  ;;  %p86_p4 = scmp.eq.s32.totalorder %s773_s14, 1 }
   0x8   : > { %s1017_s18 = scalar_select %p67_p1, %s951_s11, %s69_s16  }
   0x9   : > { %p1019_p5 = por %p80_p2, %p79_p0  ;;  %p1023_p6 = por %p86_p4, %p85_p3 }
   0xa   : > { %p776_p7 = scmp.ge.s32.totalorder %s955_s12, 1  ;;  %p114_p8 = scmp.lt.s32.totalorder %s955_s12, 3 }
   0xc   : > { %p115_p9 = pnand %p776_p7, %p114_p8 }
   0xd   : > { %v140_v0 = vld [vmem:[%s1112_s1] sm:$0x7] (!%p115_p9)  ;;  %vm145_vm0 = vcmask (!%p115_p9), 1042432   ;;  %p135_p10 = scmp.lt.s32.totalorder (!%p115_p9), %s1002_s13, 1  ;;  %v957_v1 = vmov (!%p115_p9), 0.0   ;;  %vm958_vm1 = vmmov (!%p115_p9), 0  }
   0xe   : > { %118 = sbr.rel (%p115_p9) target bundleno = 360 (0x168), region = 28  ;;  %814 = vmatprep.subr.mxu0 (!%p115_p9), %v957_v1  ;;  %v147_v2 = vsel (!%p115_p9), %vm145_vm0, %v140_v0, 0  ;;  %816 = vmatprep.mubr.msk.f32.mxu0 (!%p115_p9), %vm958_vm1, %v957_v1  ;;  %vm141_vm2 = vcmask (!%p115_p9), 23552   ;;  %v959_v30 = vmov (!%p115_p9), 683565275   ;;  %s132_s28 = sand.u32 (!%p115_p9), 1, %s947_s10  }
   0xf   : > { %v150_v3 = vand.u32 (!%p115_p9), 4294901760, %v147_v2  ;;  %799 = vmatprep.subr.mxu1 (!%p115_p9), %v957_v1  ;;  %801 = vmatprep.mubr.msk.f32.mxu1 (!%p115_p9), %vm958_vm1, %v957_v1  ;;  %v960_v32 = vmov (!%p115_p9), 2475754826   ;;  %v961_v35 = vmov (!%p115_p9), 2131351028   ;;  %s777_s29 = sshll.u32 (!%p115_p9), %s132_s28, 3 }
  0x10   : > { %v962_v38 = vmov (!%p115_p9), 2102212464   ;;  %v963_v41 = vmov (!%p115_p9), 920167782   ;;  %v964_v44 = vmov (!%p115_p9), 1326507024  }
  0x11   : > { %v227_v4 = vsub.f32 (!%p115_p9), %v147_v2, %v150_v3  ;;  %815 = vmatpush3.msra.mxu0 (!%p115_p9), %v150_v3  ;;  %800 = vmatpush3.msra.mxu1 (!%p115_p9), %v150_v3  ;;  %s784_s30 = sshll.u32 (!%p115_p9), %s1002_s13, 7  ;;  %s134_s3 = scalar_lea.vmem (!%p115_p9), [#allocation2], %s777_s29 }
  0x12   : > { %804 = vmatprep.subr.mxu1 (!%p115_p9), %v957_v1  ;;  %819 = vmatprep.subr.mxu0 (!%p115_p9), %v957_v1  ;;  %s714_s4 = sshll.u32 (!%p115_p9), %s134_s3, 4  ;;  %s1069_s7 = scalar_lea.hbm (!%p115_p9), %s1113_s2, %s784_s30  ;;  %s1071_s4 = int_to_ptr.vmem [resolvable:$true] %s714_s4 }
  0x13   : > { %v228_v7 = vand.u32 (!%p115_p9), 4294901760, %v227_v4  ;;  %s701_s8 = scalar_lea.sflag (!%p115_p9), [#allocation3], %s132_s28  ;;  %s965_s14 = smov (!%p115_p9), [#allocation2]  }
  0x14   : > { %s897_s16 = sshll.u32 (!%p115_p9), %s965_s14, 4  ;;  %s898_s16 = int_to_ptr.vmem [resolvable:$false] %s897_s16 }
  0x15   : > { %s136_s23 = scalar_select %p135_p10, %s1002_s13, 1  ;;  %v229_v10 = vsub.f32 %v227_v4, %v228_v7 }
  0x16   : > { %s893_s13 = scalar_lea.vmem %s1071_s4, 128  ;;  %s899_s17 = scalar_lea.vmem %s898_s16, 256 }
  0x17   : > { %s778_s24 = sshll.u32 %s136_s23, 3  ;;  %v230_v13 = vand.u32 4294901760, %v229_v10  ;;  %p894_p11 = scmp.ne.s32.totalorder %s1071_s4, %s893_s13 }
  0x18   : > { %s138_s27 = scalar_lea.vmem %s1111_s0, %s778_s24  ;;  %p900_p0 = scmp.lt.s32.totalorder %s1071_s4, %s898_s16 }
  0x19   : > { %v139_v5 = vld [vmem:[%s138_s27] sm:$0xff]  ;;  %p895_p12 = pnand %p894_p11, %p1019_p5  ;;  %p901_p1 = scmp.lt.s32.totalorder %s899_s17, %s893_s13 }
  0x1a   : > { %v143_v6 = vsel %vm141_vm2, %v139_v5, 0 }
  0x1b   : > { %v215_v8 = vand.u32 4294901760, %v143_v6  ;;  %p896_p13 = pneg %p895_p12  ;;  %p902_p2 = por %p901_p1, %p900_p0 }
  0x1d   : > { %v216_v9 = vsub.f32 %v143_v6, %v215_v8  ;;  %p903_p3 = pnand %p902_p2, %p896_p13 }
  0x1f   : > { %v217_v11 = vand.u32 4294901760, %v216_v9 }
  0x21   : > { %817 = vmatmul.mubr.f32.vlgmr.msra.gmra.mrb[0].mxu0 %v217_v11  ;;  %v218_v12 = vsub.f32 %v216_v9, %v217_v11 }
  0x22   : > { %820 = vmatpush3.msra.mxu0 %v228_v7  ;;  %821 = vmatprep.mubr.msk.f32.mxu0 %vm958_vm1, %v957_v1 }
  0x23   : > { %v219_v14 = vand.u32 4294901760, %v218_v12  ;;  %824 = vmatprep.subr.mxu0 %v957_v1 }
  0x25   : > { %802 = vmatmul.mubr.f32.vlgmr.msra.gmra.mrb[0].mxu1 %v219_v14 }
  0x26   : > { %805 = vmatpush3.msra.mxu1 %v230_v13  ;;  %806 = vmatprep.mubr.msk.f32.mxu1 %vm958_vm1, %v957_v1 }
  0x27   : > { %809 = vmatprep.subr.mxu1 %v957_v1 }
  0x29   : > { %822 = vmatmul.mubr.f32.vlgmr.msra.gmra.mrb[0].mxu0 %v215_v8 }
  0x2a   : > { %825 = vmatpush3.msra.mxu0 %v150_v3  ;;  %826 = vmatprep.mubr.msk.f32.mxu0 %vm958_vm1, %v957_v1 }
  0x2d   : > { %807 = vmatmul.mubr.f32.vlgmr.msra.gmra.mrb[0].mxu1 %v215_v8 }
  0x2e   : > { %810 = vmatpush3.msra.mxu1 %v227_v4  ;;  %811 = vmatprep.mubr.msk.f32.mxu1 %vm958_vm1, %v957_v1 }
  0x31   : > { %827 = vmatmul.mubr.f32.vlgmr.msra.gmra.mrb[0].mxu0 %v215_v8 }
  0x35   : > { %812 = vmatmul.mubr.f32.vlgmr.msra.gmra.mrb[0].mxu1 %v216_v9 }
 0x104   : > { %v591_v15 = vpop.f32.mrb[0].mxu0 }
 0x105   : > { %v828_v16 = vpop.f32.mrb[1].mxu0 }
 0x108   : > { %v371_v17 = vpop.f32.mrb[0].mxu1 }
 0x109   : > { %v1043_v18 = vadd.f32 %v591_v15, %v371_v17  ;;  %v813_v19 = vpop.f32.mrb[1].mxu1 }
 0x10b   : > { %v598_v20 = vand.u32 2139095040, %v1043_v18  ;;  %v595_v24 = vand.u32 2147483647, %v1043_v18  ;;  %vm597_vm10 = vcmp.lt.s32.totalorder %v1043_v18, 0  ;;  %vm687_vm15 = vweird.f32 %v1043_v18 }
 0x10d   : > { %v599_v21 = vshrl.u32 %v598_v20, 23  ;;  %v602_v27 = vand.u32 8388607, %v595_v24  ;;  %vm596_vm11 = vcmp.le.f32.partialorder %v595_v24, 0.7853982 }
 0x10f   : > { %v779_v22 = vadd.s32 4294967169, %v599_v21  ;;  %v603_v46 = vor.u32 8388608, %v602_v27 }
 0x111   : > { %v605_v23 = vadd.s32 1, %v779_v22  ;;  %v643_v60 = vshll.u32 %v603_v46, 8 }
 0x113   : > { %vm606_vm3 = vcmp.gt.s32.totalorder %v605_v23, 0 }
 0x114   : > { %v607_v25 = vsel %vm606_vm3, %v605_v23, 0 }
 0x115   : > { %v609_v26 = vand.u32 31, %v607_v25  ;;  %v608_v29 = vshrl.u32 %v607_v25, 5 }
 0x117   : > { %v610_v28 = vsub.s32 32, %v609_v26  ;;  %v612_v31 = vshll.u32 %v959_v30, %v609_v26  ;;  %v615_v33 = vshll.u32 %v960_v32, %v609_v26  ;;  %v618_v37 = vshll.u32 %v961_v35, %v609_v26 }
 0x118   : > { %v621_v40 = vshll.u32 %v962_v38, %v609_v26  ;;  %v624_v43 = vshll.u32 %v963_v41, %v609_v26  ;;  %vm627_vm4 = vcmp.lt.s32.totalorder %v608_v29, 1  ;;  %vm630_vm5 = vcmp.lt.s32.totalorder %v608_v29, 4 }
 0x119   : > { %v613_v34 = vshrl.u32 %v960_v32, %v610_v28  ;;  %v616_v36 = vshrl.u32 %v961_v35, %v610_v28  ;;  %v619_v39 = vshrl.u32 %v962_v38, %v610_v28  ;;  %v622_v42 = vshrl.u32 %v963_v41, %v610_v28 }
 0x11a   : > { %v625_v45 = vshrl.u32 %v964_v44, %v610_v28  ;;  %v611_v55 = vshrl.u32 %v959_v30, %v610_v28  ;;  %vm629_vm6 = vcmp.lt.s32.totalorder %v608_v29, 3  ;;  %vm628_vm7 = vcmp.lt.s32.totalorder %v608_v29, 2 }
 0x11b   : > { %v614_v47 = vor.u32 %v613_v34, %v612_v31  ;;  %v617_v48 = vor.u32 %v616_v36, %v615_v33  ;;  %v620_v49 = vor.u32 %v619_v39, %v618_v37  ;;  %v623_v50 = vor.u32 %v622_v42, %v621_v40 }
 0x11c   : > { %v626_v51 = vor.u32 %v625_v45, %v624_v43 }
 0x11d   : > { %v632_v52 = vsel %vm630_vm5, %v620_v49, 2102212464  ;;  %v635_v53 = vsel %vm627_vm4, %v614_v47, %v617_v48  ;;  %v639_v54 = vsel %vm627_vm4, %v617_v48, %v620_v49  ;;  %v636_v56 = vsel %vm630_vm5, %v623_v50, 920167782 }
 0x11e   : > { %v640_v57 = vsel %vm630_vm5, %v626_v51, 1326507024  ;;  %v637_v58 = vsel %vm629_vm6, %v620_v49, %v636_v56  ;;  %v631_v61 = vsel %vm627_vm4, %v611_v55, %v614_v47  ;;  %v633_v62 = vsel %vm629_vm6, %v617_v48, %v632_v52 }
 0x11f   : > { %v641_v59 = vsel %vm629_vm6, %v623_v50, %v640_v57  ;;  %v638_v63 = vsel %vm628_vm7, %v635_v53, %v637_v58  ;;  %v634_v5 = vsel %vm628_vm7, %v631_v61, %v633_v62 }
 0x120   : > { %v642_v0 = vsel %vm628_vm7, %v639_v54, %v641_v59  ;;  %v1052_v3 = vmul.u32.u64.low %v643_v60, %v638_v63  ;;  %v1053_v4 = vmul.u32.u64.high %v643_v60, %v638_v63, %v1052_v3  ;;  %v650_v7 = vmul.u32 %v643_v60, %v634_v5 }
 0x121   : > { %v1049_v1 = vmul.u32.u64.low %v643_v60, %v642_v0  ;;  %v1050_v2 = vmul.u32.u64.high %v643_v60, %v642_v0, %v1049_v1 }
 0x122   : > { %v653_v6 = vadd.s32 1, %v1053_v4 }
 0x123   : > { %vm652_vm8 = vc.u32 %v1050_v2, %v1052_v3  ;;  %v651_v20 = vadd.s32 %v1052_v3, %v1050_v2 }
 0x124   : > { %v654_v8 = vsel %vm652_vm8, %v653_v6, %v1053_v4 }
 0x125   : > { %v655_v9 = vadd.s32 %v654_v8, %v650_v7 }
 0x127   : > { %v656_v10 = vadd.s32 536870912, %v655_v9 }
 0x129   : > { %v657_v11 = vshrl.u32 %v656_v10, 30 }
 0x12b   : > { %v658_v12 = vshll.u32 %v657_v11, 30  ;;  %v681_v33 = vsub.s32 4, %v657_v11 }
 0x12d   : > { %v659_v13 = vsub.s32 %v655_v9, %v658_v12  ;;  %v682_v36 = vsel %vm597_vm10, %v681_v33, %v657_v11 }
 0x12e   : > { %v684_v38 = vsel %vm596_vm11, 0, %v682_v36 }
 0x12f   : > { %v661_v14 = vsub.s32 0, %v659_v13  ;;  %v688_v39 = vadd.s32 3, %v684_v38 }
 0x131   : > { %v780_v15 = vmin.u32 %v661_v14, %v659_v13  ;;  %v689_v40 = vand.u32 3, %v688_v39 }
 0x133   : > { %v663_v16 = vclz %v780_v15  ;;  %vm694_vm12 = vcmp.eq.s32.totalorder %v689_v40, 2  ;;  %vm691_vm13 = vcmp.eq.s32.totalorder %v689_v40, 0  ;;  %vm690_vm14 = vcmp.lt.s32.totalorder %v689_v40, 2 }
 0x135   : > { %v781_v17 = vadd.s32 4294967294, %v663_v16 }
 0x137   : > { %vm782_vm9 = vcmp.lt.s32.totalorder %v781_v17, 0 }
 0x138   : > { %v666_v19 = vsel %vm782_vm9, 0, %v781_v17 }
 0x139   : > { %v667_v21 = vsub.s32 32, %v666_v19  ;;  %v671_v22 = vsub.s32 4294967266, %v666_v19  ;;  %v668_v23 = vshll.u32 %v659_v13, %v666_v19 }
 0x13b   : > { %v669_v25 = vshrl.u32 %v651_v20, %v667_v21  ;;  %v672_v26 = vadd.s32 127, %v671_v22 }
 0x13d   : > { %v670_v27 = vor.u32 %v669_v25, %v668_v23  ;;  %v673_v28 = vshll.u32 %v672_v26, 23 }
 0x13f   : > { %v674_v29 = vor.u32 4788187, %v673_v28  ;;  %v677_v31 = vcvt.s32.f32 %v670_v27 }
 0x141   : > { %v675_v30 = vand.u32 2147483647, %v674_v29 }
 0x143   : > { %v678_v32 = vmul.f32 %v677_v31, %v675_v30 }
 0x145   : > { %v679_v34 = vxor.u32 2147483648, %v678_v32 }
 0x147   : > { %v680_v35 = vsel %vm597_vm10, %v679_v34, %v678_v32 }
 0x148   : > { %v683_v37 = vsel %vm596_vm11, %v1043_v18, %v680_v35 }
 0x149   : > { %889 = vcosq.f32 %v683_v37 }
 0x14a   : > { %891 = vsinq.f32 %v683_v37 }
 0x153   : > { %v890_v41 = vpop.eup %889 }
 0x154   : > { %v892_v42 = vpop.eup %891  ;;  %v695_v43 = vxor.u32 2147483648, %v890_v41 }
 0x155   : > { %v692_v44 = vxor.u32 2147483648, %v892_v42 }
 0x156   : > { %v696_v24 = vsel %vm694_vm12, %v695_v43, %v892_v42 }
 0x157   : > { %v693_v45 = vsel %vm691_vm13, %v890_v41, %v692_v44 }
 0x158   : > { %v697_v46 = vsel %vm690_vm14, %v693_v45, %v696_v24 }
 0x159   : > { %v698_v47 = vsel %vm687_vm15, nan, %v697_v46 }
 0x15a   : > { %699 = vst [vmem:[%s134_s3] sm:$0xff] %v698_v47 }
 0x15b   : > { %906 = shalt.err (!%p903_p3)
}
 0x15c   : > { %s907_s21 = scalar_lea.hbm %s1069_s7, 128  ;;  %s911_s24 = scalar_lea.hbm %s1113_s2, 256 }
 0x15d   : > { %p908_p4 = scmp.ne.s32.totalorder %s1069_s7, %s907_s21  ;;  %p912_p9 = scmp.lt.u32.totalorder %s1069_s7, %s1113_s2 }
 0x15e   : > { %p913_p10 = scmp.lt.u32.totalorder %s911_s24, %s907_s21  ;;  %p915_p12 = scmp.lt.u32.totalorder %s907_s21, %s1069_s7 }
 0x15f   : > { %p909_p7 = pnand %p908_p4, %p1019_p5 }
 0x160   : > { %p914_p11 = por %p913_p10, %p912_p9 }
 0x161   : > { %p910_p8 = pneg %p909_p7 }
 0x162   : > { %p916_p13 = por %p915_p12, %p914_p11 }
 0x164   : > { %p917_p0 = pnand %p916_p13, %p910_p8 }
 0x166   : > { %920 = shalt.err (!%p917_p0)
}
 0x167   : > { %842 = dma.vmem_to_hbm [thread:$0]  (%p1019_p5), %s1071_s4, 128, %s1069_s7, %s701_s8  }
 0x168 PF: > { %p848_p1 = scmp.ge.s32.totalorder %s955_s12, 2  ;;  %s726_s27 = sand.u32 1, %s943_s9  }
 0x169   : > { %s727_s28 = scalar_lea.sflag [#allocation3], %s726_s27 }
 0x16a   : > { %p845_p2 = pnand %p848_p1, %p1023_p6 }
 0x16c   : > { %938 = dma.done.wait (!%p845_p2), %s727_s28, 128  }
 0x16d   : > { %940 = vsyncadd (!%p845_p2), %s727_s28, 4294967168  ;;  %p12_p3 = scmp.ge.s32.totalorder %s1006_s15, 4   ;;  %s1116_s9 = smov %s947_s10 }
 0x16e   : > { %s1117_s10 = smov %s951_s11  ;;  %s1118_s11 = smov %s1017_s18 }
 0x16f   : > { %s1119_s12 = smov %s1006_s15  ;;  %14 = sbr.rel (!%p12_p3) target bundleno = 3 (0x3), region = 63 }
 0x176   :  { %732 = vsyncpa [#allocation3], 1 }
 0x177   :  { %734 = vsyncpa [#allocation3 + $0x1], 1 }

</bundles_post_ra>
